<compile_context>
chip_gen: v6e
topology: v6e:2x2x1
jax: 0.10.0
libtpu: 0.0.40
codegen_flags: <defaults>
</compile_context>

<pallas_src>
import functools

import jax
import jax.numpy as jnp
from jax.experimental import pallas as pl
from jax.experimental.pallas import tpu as pltpu


def _tensorcores_per_chip():
    """2 for multi-TensorCore chips (v7x); 1 for v5e/v6e (and on any failure)."""
    try:
        kind = jax.devices()[0].device_kind.lower()
    except Exception:
        return 1
    if "v7" in kind or "7x" in kind:
        return 2
    return 1


def _focal_loss_kernel(logits_ref, tgt_ref, out_ref, acc_ref, *, alpha, gamma,
                       ignore_index, hw, tile, pg):
    """One (C, tile) slab of pixels for one (image, core-split) pair.

    logits_ref: (C, tile) float     -- classes on sublanes, pixels on lanes
    tgt_ref:    (1, tile) int (any <=32-bit integer dtype; upcast here)
    out_ref:    (1, 128) float32    -- lane-dense folded partial sum, written
                                       only on the last reduction step
    acc_ref:    (1, tile) float32   -- resident per-lane accumulator (scratch)
    """
    s = pl.program_id(1)          # core-split index
    p = pl.program_id(2)          # pixel-block index within the split

    logits = logits_ref[...].astype(jnp.float32)               # (C, T)
    tgt = tgt_ref[...].astype(jnp.int32)                        # (1, T)

    # Numerically-stable log-softmax pieces over the class (sublane) axis.
    m = jnp.max(logits, axis=0, keepdims=True)                  # (1, T)
    shifted = logits - m                                         # (C, T)
    sumexp = jnp.sum(jnp.exp(shifted), axis=0, keepdims=True)    # (1, T)
    lse = jnp.log(sumexp)                                        # (1, T)

    # Select (no float one-hot, no extra multiply) the target class row.
    cls_iota = jax.lax.broadcasted_iota(jnp.int32, logits.shape, 0)
    tgt_shifted = jnp.sum(jnp.where(cls_iota == tgt, shifted, 0.0),
                          axis=0, keepdims=True)                 # (1, T)
    ce = lse - tgt_shifted                                       # (1, T)

    # Focal modulation, specialized on the static gamma.
    if gamma == 0.0:
        focal = alpha * ce                 # (1 - pt)**0 == 1; skip pt entirely
    else:
        pt = jnp.exp(tgt_shifted - lse)    # exact exp(-ce); one (1,T) EUP exp
        one_m_pt = 1.0 - pt
        if gamma == int(gamma) and 1.0 <= gamma <= 4.0:
            mod = one_m_pt                  # small integer gamma -> VPU muls
            for _ in range(int(gamma) - 1):
                mod = mod * one_m_pt
        else:
            # 1-ulp rounding can make pt marginally exceed 1; guard the
            # fractional-power path against a tiny negative base -> NaN.
            mod = jnp.power(jnp.maximum(one_m_pt, 0.0), gamma)
        focal = (alpha * mod) * ce

    # Mask: ignore_index pixels and out-of-range lanes (ragged edge block)
    # contribute exactly 0; this also kills garbage read from the partially
    # out-of-bounds edge block.
    lane = jax.lax.broadcasted_iota(jnp.int32, tgt.shape, 1)     # (1, T)
    pix = (s * pg + p) * tile + lane
    valid = jnp.logical_and(tgt != ignore_index, pix < hw)
    focal = jnp.where(valid, focal, 0.0)

    @pl.when(p == 0)
    def _():
        acc_ref[...] = jnp.zeros_like(acc_ref)

    acc_ref[...] += focal

    # Final step: fold the (1, tile) per-lane partial sums into one lane-dense
    # (1, 128) block (static lane-aligned adds, pairwise tree) and write it.
    @pl.when(p == pg - 1)
    def _():
        acc = acc_ref[...]
        chunks = [acc[:, i * 128:(i + 1) * 128] for i in range(tile // 128)]
        while len(chunks) > 1:
            nxt = []
            for j in range(0, len(chunks) - 1, 2):
                nxt.append(chunks[j] + chunks[j + 1])
            if len(chunks) % 2:
                nxt.append(chunks[-1])
            chunks = nxt
        out_ref[...] = chunks[0]


def focal_loss(inputs, targets, *, alpha=1.0, gamma=0.0, size_average=True,
               ignore_index=255, pixel_tile=None,
               vmem_budget_bytes=20 * 1024 * 1024):
    """inputs: (N, C, H, W) float logits (f32 or bf16).
    targets: (N, H, W) integer class ids; narrow dtypes (uint8/int16) are
    passed through untouched and upcast per-tile inside the kernel."""
    N, C, H, W = inputs.shape
    HW = H * W
    P = N * HW

    # Free reshapes only -- no transpose, no pad, no extra HBM pass.
    logits = inputs.reshape(N, C, HW)
    if jnp.issubdtype(targets.dtype, jnp.integer) and \
            jnp.dtype(targets.dtype).itemsize <= 4:
        tgt = targets.reshape(N, 1, HW)          # keep narrow dtype as stored
    else:
        tgt = targets.reshape(N, 1, HW).astype(jnp.int32)

    in_itemsize = jnp.dtype(inputs.dtype).itemsize
    tgt_itemsize = jnp.dtype(tgt.dtype).itemsize

    # VMEM working-set model, bytes per lane (pixel):
    #   2x double-buffered logits tile + 2x double-buffered target tile
    #   + resident (1, tile) f32 accumulator
    #   + ~5 live (C, tile) f32 temporaries (shifted, exp, iota, select, prod)
    #   + ~8 (1, tile) f32 rows (m, sumexp, lse, ce, pt, focal, masks, ...).
    per_lane_bytes = (2 * C * in_itemsize + 2 * tgt_itemsize + 4
                      + 5 * C * 4 + 8 * 4)

    if pixel_tile is None:
        # Aim for ~2 MiB of logits per grid step so per-step overhead (~0.35us)
        # amortizes to near the HBM roofline, even on v7x's 3.2 TB/s.
        pixel_tile = (2 * 1024 * 1024) // max(C * in_itemsize, 1)
    pixel_tile = min(max(int(pixel_tile), 128), 32768)

    budget_tile = max(vmem_budget_bytes // per_lane_bytes, 128)
    hw_tile = ((HW + 127) // 128) * 128
    tile = min(pixel_tile, budget_tile, hw_tile)
    tile = max(128, (tile // 128) * 128)

    nblocks = -(-HW // tile)                   # pixel blocks per image

    # Core split only where it helps: multi-TC chips (v7x) whose batch axis
    # cannot already feed both cores, and only when it divides the block
    # count evenly (no clamped duplicate block -> no wasted DMA/compute).
    num_tc = _tensorcores_per_chip()
    nsplit = 1
    if (num_tc >= 2 and (N % num_tc != 0) and N < 2 * num_tc
            and nblocks >= 2 and nblocks % 2 == 0):
        nsplit = 2
    pg = nblocks // nsplit                     # blocks per split (reduction axis)

    # Compiler VMEM limit derived from the actual working set (kept well under
    # v7x's 64 MiB physical VMEM), not a blind hardcode.
    working_set = per_lane_bytes * tile + (1 << 20)
    vmem_limit = int(min(max(32 * 1024 * 1024, working_set + 8 * 1024 * 1024),
                         48 * 1024 * 1024))

    kernel = functools.partial(
        _focal_loss_kernel, alpha=float(alpha), gamma=float(gamma),
        ignore_index=int(ignore_index), hw=HW, tile=tile, pg=pg)

    # NOTE: C is deliberately NOT padded to a multiple of 8: the kernel is
    # HBM-bound and padding would cost a full extra HBM copy of the logits.

    partial_rows = pl.pallas_call(
        kernel,
        out_shape=jax.ShapeDtypeStruct((N * nsplit, 1, 128), jnp.float32),
        grid_spec=pltpu.PrefetchScalarGridSpec(
            num_scalar_prefetch=0,
            grid=(N, nsplit, pg),
            in_specs=[
                pl.BlockSpec((None, C, tile), lambda n, s, p: (n, 0, s * pg + p)),
                pl.BlockSpec((None, 1, tile), lambda n, s, p: (n, 0, s * pg + p)),
            ],
            out_specs=pl.BlockSpec((None, 1, 128),
                                   lambda n, s, p: (n * nsplit + s, 0, 0)),
            scratch_shapes=[pltpu.VMEM((1, tile), jnp.float32)],
        ),
        compiler_params=pltpu.CompilerParams(
            dimension_semantics=("parallel", "parallel", "arbitrary"),
            vmem_limit_bytes=vmem_limit),
    )(logits, tgt)

    total = jnp.sum(partial_rows, dtype=jnp.float32)
    if size_average:
        return total / P     # torch .mean(): divide by ALL pixels, incl. ignored
    return total


def _focal_loss_ref(inputs, targets, *, alpha=1.0, gamma=0.0, size_average=True,
                    ignore_index=255):
    # Pure-JAX reference mirroring F.cross_entropy(reduction='none', ignore_index).
    N, C, H, W = inputs.shape
    logits = jnp.transpose(inputs, (0, 2, 3, 1)).reshape(-1, C).astype(jnp.float32)
    tgt = targets.reshape(-1).astype(jnp.int32)
    logp = jax.nn.log_softmax(logits, axis=-1)
    safe_tgt = jnp.where(tgt == ignore_index, 0, tgt)
    ce = -jnp.take_along_axis(logp, safe_tgt[:, None], axis=-1)[:, 0]
    ce = jnp.where(tgt == ignore_index, 0.0, ce)
    pt = jnp.exp(-ce)
    focal = alpha * (1.0 - pt) ** gamma * ce
    return focal.mean() if size_average else focal.sum()


if __name__ == "__main__":
    key = jax.random.PRNGKey(0)
    k1, k2, k3, k4, k5, k6, k7 = jax.random.split(key, 7)

    # --- Case 1: module defaults (alpha=1, gamma=0), f32 NCHW logits ---------
    N, C, H, W = 2, 4, 16, 16
    inputs = jax.random.normal(k1, (N, C, H, W), dtype=jnp.float32)
    targets = jax.random.randint(k2, (N, H, W), 0, C, dtype=jnp.int32)
    ignore_mask = jax.random.bernoulli(k3, 0.1, (N, H, W))
    targets = jnp.where(ignore_mask, 255, targets)

    out = jax.block_until_ready(focal_loss(inputs, targets))
    ref = jax.block_until_ready(_focal_loss_ref(inputs, targets))
    assert jnp.allclose(out, ref, rtol=1e-5, atol=1e-6), ("case1", out, ref)

    # --- Case 2: bf16 logits at the kernel boundary (half HBM traffic) -------
    inputs_bf16 = inputs.astype(jnp.bfloat16)
    out_bf = jax.block_until_ready(focal_loss(inputs_bf16, targets))
    ref_bf = jax.block_until_ready(
        _focal_loss_ref(inputs_bf16.astype(jnp.float32), targets))
    assert jnp.allclose(out_bf, ref_bf, rtol=1e-4, atol=1e-5), ("case2", out_bf, ref_bf)

    # --- Case 3: gamma=2 (focal modulation, exact pt path -> tight tol) ------
    out_g2 = jax.block_until_ready(focal_loss(inputs, targets, alpha=0.25, gamma=2.0))
    ref_g2 = jax.block_until_ready(
        _focal_loss_ref(inputs, targets, alpha=0.25, gamma=2.0))
    assert jnp.allclose(out_g2, ref_g2, rtol=5e-5, atol=1e-6), ("case3", out_g2, ref_g2)

    # --- Case 4: ragged pixel count, multi-block reduction, uint8 targets ----
    # H*W = 300 -> 3 blocks of 128 (ragged): exercises the lane mask, the
    # narrow-target in-kernel upcast, and size_average=False.
    N4, C4, H4, W4 = 2, 6, 20, 15
    inputs4 = jax.random.normal(k4, (N4, C4, H4, W4), dtype=jnp.float32)
    targets4 = jax.random.randint(k5, (N4, H4, W4), 0, C4, dtype=jnp.int32)
    targets4 = jnp.where(jax.random.bernoulli(k3, 0.1, (N4, H4, W4)), 255, targets4)
    targets4_u8 = targets4.astype(jnp.uint8)

    out4 = jax.block_until_ready(
        focal_loss(inputs4, targets4_u8, size_average=False, pixel_tile=128))
    ref4 = jax.block_until_ready(
        _focal_loss_ref(inputs4, targets4, size_average=False))
    assert jnp.allclose(out4, ref4, rtol=1e-5, atol=1e-4), ("case4", out4, ref4)

    # --- Case 5: N=1 (core-split path on multi-TC chips), 8-block reduction --
    N5, C5, H5, W5 = 1, 4, 32, 32
    inputs5 = jax.random.normal(k6, (N5, C5, H5, W5), dtype=jnp.float32)
    targets5 = jax.random.randint(k7, (N5, H5, W5), 0, C5, dtype=jnp.int32)
    targets5 = jnp.where(jax.random.bernoulli(k3, 0.1, (N5, H5, W5)), 255, targets5)

    out5 = jax.block_until_ready(
        focal_loss(inputs5, targets5, alpha=0.25, gamma=2.0, pixel_tile=128))
    ref5 = jax.block_until_ready(
        _focal_loss_ref(inputs5, targets5, alpha=0.25, gamma=2.0))
    assert jnp.allclose(out5, ref5, rtol=5e-5, atol=1e-6), ("case5", out5, ref5)

    print("KERNEL_OK")
</pallas_src>

<mosaic_0001>
module attributes {stable_mosaic.version = 11 : i64} {
  func.func @_focal_loss_kernel(%arg0: i32, %arg1: i32, %arg2: i32, %arg3: memref<1x4x256xf32, #tpu.memory_space<vmem>>, %arg4: memref<1x1x256xi32, #tpu.memory_space<vmem>>, %arg5: memref<1x1x128xf32, #tpu.memory_space<vmem>>, %arg6: memref<1x256xf32, #tpu.memory_space<vmem>>) attributes {dimension_semantics = [#tpu.dimension_semantics<parallel>, #tpu.dimension_semantics<parallel>, #tpu.dimension_semantics<arbitrary>], iteration_bounds = array<i64: 2, 1, 1>, scalar_prefetch = 0 : i64, scratch_operands = 1 : i64, tpu.core_type = #tpu.core_type<tc>, window_params = [{transform_indices = @transform_0, window_bounds = array<i64: 1, 4, 256>}, {transform_indices = @transform_1, window_bounds = array<i64: 1, 1, 256>}, {transform_indices = @transform_2, window_bounds = array<i64: 1, 1, 128>}]} {
    %c0 = arith.constant 0 : index
    %c0_0 = arith.constant 0 : index
    %c0_1 = arith.constant 0 : index
    %0 = vector.load %arg3[%c0, %c0_0, %c0_1] : memref<1x4x256xf32, #tpu.memory_space<vmem>>, vector<1x4x256xf32>
    %1 = vector.shape_cast %0 : vector<1x4x256xf32> to vector<4x256xf32>
    %c0_2 = arith.constant 0 : index
    %c0_3 = arith.constant 0 : index
    %c0_4 = arith.constant 0 : index
    %2 = vector.load %arg4[%c0_2, %c0_3, %c0_4] : memref<1x1x256xi32, #tpu.memory_space<vmem>>, vector<1x1x256xi32>
    %3 = vector.shape_cast %2 : vector<1x1x256xi32> to vector<1x256xi32>
    %cst = arith.constant dense<0xFF800000> : vector<256xf32>
    %4 = vector.multi_reduction <maximumf>, %1, %cst [0] : vector<4x256xf32> to vector<256xf32>
    %5 = vector.shape_cast %4 : vector<256xf32> to vector<1x256xf32>
    %6 = vector.broadcast %5 : vector<1x256xf32> to vector<4x256xf32>
    %7 = arith.subf %1, %6 : vector<4x256xf32>
    %8 = math.exp %7 : vector<4x256xf32>
    %cst_5 = arith.constant dense<0.000000e+00> : vector<256xf32>
    %9 = vector.multi_reduction <add>, %8, %cst_5 [0] : vector<4x256xf32> to vector<256xf32>
    %10 = vector.shape_cast %9 : vector<256xf32> to vector<1x256xf32>
    %11 = math.log %10 : vector<1x256xf32>
    %12 = tpu.iota {dimensions = array<i32: 0>} : vector<4x256xi32>
    %13 = vector.broadcast %3 : vector<1x256xi32> to vector<4x256xi32>
    %14 = arith.cmpi eq, %12, %13 : vector<4x256xi32>
    %cst_6 = arith.constant 0.000000e+00 : f32
    %15 = vector.broadcast %cst_6 : f32 to vector<4x256xf32>
    %16 = arith.select %14, %7, %15 : vector<4x256xi1>, vector<4x256xf32>
    %cst_7 = arith.constant dense<0.000000e+00> : vector<256xf32>
    %17 = vector.multi_reduction <add>, %16, %cst_7 [0] : vector<4x256xf32> to vector<256xf32>
    %18 = vector.shape_cast %17 : vector<256xf32> to vector<1x256xf32>
    %19 = arith.subf %11, %18 : vector<1x256xf32>
    %cst_8 = arith.constant 1.000000e+00 : f32
    %20 = vector.broadcast %cst_8 : f32 to vector<1x256xf32>
    %21 = arith.mulf %20, %19 : vector<1x256xf32>
    %22 = tpu.iota {dimensions = array<i32: 1>} : vector<1x256xi32>
    %c1_i32 = arith.constant 1 : i32
    %23 = arith.muli %arg1, %c1_i32 : i32
    %24 = arith.addi %23, %arg2 : i32
    %c256_i32 = arith.constant 256 : i32
    %25 = arith.muli %24, %c256_i32 : i32
    %26 = vector.broadcast %25 : i32 to vector<1x256xi32>
    %27 = arith.addi %26, %22 : vector<1x256xi32>
    %c255_i32 = arith.constant 255 : i32
    %28 = vector.broadcast %c255_i32 : i32 to vector<1x256xi32>
    %29 = arith.cmpi ne, %3, %28 : vector<1x256xi32>
    %c256_i32_9 = arith.constant 256 : i32
    %30 = vector.broadcast %c256_i32_9 : i32 to vector<1x256xi32>
    %31 = arith.cmpi slt, %27, %30 : vector<1x256xi32>
    %32 = arith.andi %29, %31 : vector<1x256xi1>
    %cst_10 = arith.constant 0.000000e+00 : f32
    %33 = vector.broadcast %cst_10 : f32 to vector<1x256xf32>
    %34 = arith.select %32, %21, %33 : vector<1x256xi1>, vector<1x256xf32>
    %c0_i32 = arith.constant 0 : i32
    %35 = arith.cmpi eq, %arg2, %c0_i32 : i32
    %36 = arith.extui %35 : i1 to i32
    %c0_i32_11 = arith.constant 0 : i32
    %37 = arith.cmpi ne, %36, %c0_i32_11 : i32
    scf.if %37 {
      %cst_18 = arith.constant 0.000000e+00 : f32
      %44 = vector.broadcast %cst_18 : f32 to vector<1x256xf32>
      %c0_19 = arith.constant 0 : index
      %c0_20 = arith.constant 0 : index
      %45 = vector.load %arg6[%c0_19, %c0_20] : memref<1x256xf32, #tpu.memory_space<vmem>>, vector<1x256xf32>
      tpu.vector_store %arg6[%c0_19, %c0_20], %44 {strides = array<i32>} : memref<1x256xf32, #tpu.memory_space<vmem>>, vector<1x256xf32>,
    } else {
    }
    %c0_12 = arith.constant 0 : index
    %c0_13 = arith.constant 0 : index
    %38 = vector.load %arg6[%c0_12, %c0_13] : memref<1x256xf32, #tpu.memory_space<vmem>>, vector<1x256xf32>
    %39 = arith.addf %38, %34 : vector<1x256xf32>
    %c0_14 = arith.constant 0 : index
    %c0_15 = arith.constant 0 : index
    %40 = vector.load %arg6[%c0_14, %c0_15] : memref<1x256xf32, #tpu.memory_space<vmem>>, vector<1x256xf32>
    tpu.vector_store %arg6[%c0_14, %c0_15], %39 {strides = array<i32>} : memref<1x256xf32, #tpu.memory_space<vmem>>, vector<1x256xf32>,
    %c0_i32_16 = arith.constant 0 : i32
    %41 = arith.cmpi eq, %arg2, %c0_i32_16 : i32
    %42 = arith.extui %41 : i1 to i32
    %c0_i32_17 = arith.constant 0 : i32
    %43 = arith.cmpi ne, %42, %c0_i32_17 : i32
    scf.if %43 {
      %c0_18 = arith.constant 0 : index
      %c0_19 = arith.constant 0 : index
      %44 = vector.load %arg6[%c0_18, %c0_19] : memref<1x256xf32, #tpu.memory_space<vmem>>, vector<1x256xf32>
      %45 = vector.extract_strided_slice %44 {offsets = [0, 0], sizes = [1, 128], strides = [1, 1]} : vector<1x256xf32> to vector<1x128xf32>
      %46 = vector.extract_strided_slice %44 {offsets = [0, 128], sizes = [1, 128], strides = [1, 1]} : vector<1x256xf32> to vector<1x128xf32>
      %47 = arith.addf %45, %46 : vector<1x128xf32>
      %c0_20 = arith.constant 0 : index
      %c0_21 = arith.constant 0 : index
      %c0_22 = arith.constant 0 : index
      %48 = vector.load %arg5[%c0_20, %c0_21, %c0_22] : memref<1x1x128xf32, #tpu.memory_space<vmem>>, vector<1x1x128xf32>
      %49 = vector.shape_cast %48 : vector<1x1x128xf32> to vector<1x128xf32>
      %50 = vector.shape_cast %47 : vector<1x128xf32> to vector<1x1x128xf32>
      tpu.vector_store %arg5[%c0_20, %c0_21, %c0_22], %50 {strides = array<i32>} : memref<1x1x128xf32, #tpu.memory_space<vmem>>, vector<1x1x128xf32>,
    } else {
    }
    return
  }
  func.func @transform_0(%arg0: i32, %arg1: i32, %arg2: i32) -> (i32, i32, i32) {
    %c1_i32 = arith.constant 1 : i32
    %0 = arith.muli %arg1, %c1_i32 : i32
    %1 = arith.addi %0, %arg2 : i32
    %c0_i32 = arith.constant 0 : i32
    %c0_i32_0 = arith.constant 0 : i32
    return %arg0, %c0_i32, %1 : i32, i32, i32
  }
  func.func @transform_1(%arg0: i32, %arg1: i32, %arg2: i32) -> (i32, i32, i32) {
    %c1_i32 = arith.constant 1 : i32
    %0 = arith.muli %arg1, %c1_i32 : i32
    %1 = arith.addi %0, %arg2 : i32
    %c0_i32 = arith.constant 0 : i32
    %c0_i32_0 = arith.constant 0 : i32
    return %arg0, %c0_i32, %1 : i32, i32, i32
  }
  func.func @transform_2(%arg0: i32, %arg1: i32, %arg2: i32) -> (i32, i32, i32) {
    %c1_i32 = arith.constant 1 : i32
    %0 = arith.muli %arg0, %c1_i32 : i32
    %1 = arith.addi %0, %arg1 : i32
    %c0_i32 = arith.constant 0 : i32
    %c0_i32_0 = arith.constant 0 : i32
    %c0_i32_1 = arith.constant 0 : i32
    return %1, %c0_i32, %c0_i32_0 : i32, i32, i32
  }
}

</mosaic_0001>

<bundles_post_ra>
// kernel: tpu_custom_call.1
= control target key start
LH: loop header
LB: loop body
LE: loop exit
PB: predicated region body
PF: predicated region fallthrough
CT: control target
= control target key end

     0   :  { %7 = vsyncpa [#allocation4], 0  ;;  %s952_s0 = inlined_call_operand.hbm [shape: f32[2,4,256], index: 0, kind: input, shape index: {}]   ;;  %s953_s1 = inlined_call_operand.hbm [shape: s32[2,1,256], index: 1, kind: input, shape index: {}]   ;;  %s954_s2 = inlined_call_operand.hbm [shape: f32[2,1,128], index: 2, kind: output, shape index: {}]  }
   0x1   :  { %9 = vsyncpa [#allocation4 + $0x1], 0 }
   0x2   :  { %10 = vsyncpa [#allocation7], 0 }
   0x3   :  { %12 = vsyncpa [#allocation7 + $0x1], 0 }
   0x4   :  { %13 = vsyncpa [#allocation5], 0 }
   0x5   :  { %15 = vsyncpa [#allocation5 + $0x1], 0  ;;  %s773_s9 = smov 0   ;;  %s775_s10 = smov 0  }
   0x6   :  { %s777_s11 = smov 0   ;;  %s779_s12 = smov 0  }
   0x7   :  { %s781_s13 = smov 0   ;;  %s783_s14 = smov 0  }
   0x8 LB: > { %s515_s15 = sadd.s32 4294967295, %s750_s14   ;;  %s516_s16 = sadd.s32 4294967294, %s750_s14   ;;  %s750_s14 = sphi %s783_s14, %s21_s14   ;;  %s746_s13 = sphi %s781_s13, %s968_s13   ;;  %s742_s12 = sphi %s779_s12, %s967_s12   ;;  %s738_s11 = sphi %s777_s11, %s966_s11   ;;  %s734_s10 = sphi %s775_s10, %s965_s10   ;;  %s730_s9 = sphi %s773_s9, %s964_s9  }
   0x9   : > { %s40_s17 = sadd.s32 1, %s746_s13  ;;  %s51_s18 = sadd.s32 1, %s738_s11 }
   0xa   : > { %p42_p0 = scmp.ge.s32.totalorder %s40_s17, 2  ;;  %p58_p1 = scmp.ne.s32.totalorder %s738_s11, %s734_s10 }
   0xb   : > { %p59_p2 = scmp.eq.s32.totalorder %s750_s14, 0  ;;  %p64_p3 = scmp.ne.s32.totalorder %s734_s10, %s730_s9 }
   0xc   : > { %s970_s17 = smov (%p42_p0, %s40_s17), 0  ;;  %p65_p5 = scmp.eq.s32.totalorder %s515_s15, 0 }
   0xd   : > { %p814_p4 = por %p59_p2, %p58_p1  ;;  %s46_s20 = ssub.s32 %s746_s13, %s970_s17 }
   0xe   : > { %p120_p6 = scmp.eq.s32.totalorder %s515_s15, 1  ;;  %p49_p7 = scmp.eq.s32.totalorder %s46_s20, 0 }
   0xf   : > { %p820_p8 = por %p65_p5, %p64_p3  ;;  %p126_p10 = scmp.eq.s32.totalorder %s516_s16, 1 }
  0x10   : > { %p824_p9 = por %p120_p6, %p58_p1  ;;  %p550_p13 = scmp.lt.s32.totalorder %s750_s14, 2 }
  0x11   : > { %s829_s23 = scalar_select %p49_p7, %s738_s11, %s51_s18  }
  0x12   : > { %p831_p11 = por %p126_p10, %p64_p3  ;;  %s838_s25 = sand.u32 1, %s738_s11  }
  0x13   : > { %s519_s26 = sshll.u32 %s838_s25, 3  ;;  %s531_s27 = sshll.u32 %s746_s13, 7 }
  0x14   : > { %s159_s30 = scalar_lea.hbm %s952_s0, %s531_s27  ;;  %s150_s3 = scalar_lea.vmem [#allocation3], %s519_s26 }
  0x15   : > { %s161_s4 = sshll.u32 %s150_s3, 4  ;;  %p847_p0 = pnand %p550_p13, %p814_p4  ;;  %s162_s4 = int_to_ptr.vmem [resolvable:$true] %s161_s4 }
  0x16   : > { %p525_p1 = scmp.ge.s32.totalorder %s750_s14, 1  ;;  %p188_p2 = scmp.lt.s32.totalorder %s750_s14, 3 }
  0x17   : > { %s147_s6 = scalar_lea.sflag [#allocation4], %s838_s25  ;;  %p612_p3 = pneg %p847_p0 }
  0x18   : > { %s623_s7 = scalar_lea.vmem %s162_s4, 128  ;;  %s752_s8 = smov [#allocation3]  }
  0x19   : > { %p624_p5 = scmp.ne.s32.totalorder %s162_s4, %s623_s7  ;;  %s628_s15 = sshll.u32 %s752_s8, 4  ;;  %s629_s15 = int_to_ptr.vmem [resolvable:$false] %s628_s15 }
  0x1a   : > { %s630_s16 = scalar_lea.vmem %s629_s15, 256  ;;  %p631_p4 = scmp.lt.s32.totalorder %s162_s4, %s629_s15 }
  0x1b   : > { %p626_p6 = pnand %p624_p5, %p612_p3  ;;  %p632_p10 = scmp.lt.s32.totalorder %s630_s16, %s623_s7 }
  0x1d   : > { %p627_p7 = pneg %p626_p6  ;;  %p633_p13 = por %p632_p10, %p631_p4 }
  0x1f   : > { %p634_p12 = pnand %p633_p13, %p627_p7 }
  0x21   : > { %637 = shalt.err (!%p634_p12)
}
  0x22   : > { %542 = dma.hbm_to_vmem [thread:$0]  (!%p847_p0), %s159_s30, 128, %s162_s4, %s147_s6  }
  0x23   : > { %p865_p5 = pnand %p525_p1, %p188_p2  ;;  %s522_s19 = sshll.u32 %s838_s25, 1 }
  0x24   : > { %s532_s20 = sshll.u32 %s746_s13, 5  ;;  %s172_s29 = scalar_lea.vmem [#allocation6], %s522_s19 }
  0x25   : > { %s181_s28 = scalar_lea.hbm %s953_s1, %s532_s20  ;;  %s183_s3 = sshll.u32 %s172_s29, 4  ;;  %s184_s3 = int_to_ptr.vmem [resolvable:$true] %s183_s3 }
  0x26   : > { %s169_s7 = scalar_lea.sflag [#allocation7], %s838_s25  ;;  %s651_s8 = scalar_lea.vmem %s184_s3, 32 }
  0x27   : > { %p652_p12 = scmp.ne.s32.totalorder %s184_s3, %s651_s8  ;;  %s753_s30 = smov [#allocation6]  }
  0x28   : > { %s656_s4 = sshll.u32 %s753_s30, 4  ;;  %s657_s4 = int_to_ptr.vmem [resolvable:$false] %s656_s4 }
  0x29   : > { %p654_p6 = pnand %p652_p12, %p612_p3  ;;  %s658_s6 = scalar_lea.vmem %s657_s4, 64 }
  0x2a   : > { %p659_p1 = scmp.lt.s32.totalorder %s184_s3, %s657_s4  ;;  %p660_p2 = scmp.lt.s32.totalorder %s658_s6, %s651_s8 }
  0x2b   : > { %p655_p7 = pneg %p654_p6 }
  0x2c   : > { %p661_p4 = por %p660_p2, %p659_p1 }
  0x2e   : > { %p662_p10 = pnand %p661_p4, %p655_p7 }
  0x30   : > { %665 = shalt.err (!%p662_p10)
}
  0x31   : > { %545 = dma.hbm_to_vmem [thread:$0]  (!%p847_p0), %s181_s28, 32, %s184_s3, %s169_s7  }
  0x32   : > { %192 = sbr.rel (%p865_p5) target bundleno = 162 (0xa2), region = 28  ;;  %s883_s25 = sand.u32 (!%p865_p5), 1, %s734_s10  }
  0x33   : > { %s526_s15 = sshll.u32 (!%p865_p5), %s883_s25, 3  ;;  %s195_s16 = scalar_lea.sflag (!%p865_p5), [#allocation4], %s883_s25 }
  0x34   : > { %s198_s19 = scalar_lea.vmem (!%p865_p5), [#allocation3], %s526_s15 }
  0x37   : > { %717 = dma.done.wait (%p820_p8), %s195_s16, 128  }
  0x38   : > { %719 = vsyncadd (%p820_p8), %s195_s16, 4294967168  ;;  %s527_s5 = sshll.u32 %s883_s25, 1  ;;  %s204_s18 = scalar_lea.sflag [#allocation7], %s883_s25 }
  0x39   : > { %s207_s20 = scalar_lea.vmem [#allocation6], %s527_s5 }
  0x3a   : > { %721 = dma.done.wait (%p820_p8), %s204_s18, 32  }
  0x3b   : > { %723 = vsyncadd (%p820_p8), %s204_s18, 4294967264  ;;  %v285_v0 = vlaneseq  ;;  %v754_v2 = vmov 0.0   ;;  %vm242_vm1 = vcmask 1043456   ;;  %v237_v3 = vld [vmem:[%s198_s19] sm:$0xff]  ;;  %v238_v24 = vld [vmem:[%s207_s20] sm:$0x3] }
  0x3c   : > { %v240_v4 = vcombine.high %v237_v3, %v237_v3  ;;  %v243_v5 = vsel %vm242_vm1, %v237_v3, -inf  ;;  %v755_v54 = vmov 1966171168   ;;  %v756_v61 = vmov 1   ;;  %s231_s21 = scalar_lea.vmem [#allocation8], %s883_s25  ;;  %s528_s27 = sshll.u32 %s742_s12, 4 }
  0x3d   : > { %vm897_vm0 = vcmp.lt.s32.totalorder %v285_v0, 256  ;;  %v244_v6 = vrot.slane %v243_v5, 4  ;;  %v286_v21 = vshrl.u32 %v285_v0, 7  ;;  %v333_v55 = vunpack.c.l.s4 %v755_v54  ;;  %s406_s26 = sshll.u32 %s231_s21, 4  ;;  %s404_s3 = scalar_lea.hbm %s954_s2, %s528_s27  ;;  %s407_s26 = int_to_ptr.vmem [resolvable:$true] %s406_s26 }
  0x3e   : > { %375 = vst.msk [vmem:[#allocation2] sm:$0x3] %vm897_vm0, %v754_v2  ;;  %v250_v7 = vsel %vm242_vm1, %v240_v4, -inf  ;;  %v331_v62 = vcombine.low %v756_v61, %v756_v61  ;;  %vm326_vm4 = vcmp.ne.s32.totalorder %v238_v24, 255  ;;  %s393_s7 = scalar_lea.sflag [#allocation5], %s883_s25  ;;  %s666_s8 = scalar_lea.vmem %s407_s26, 16 }
  0x3f   : > { %v245_v8 = vmax.f32 %v243_v5, %v244_v6  ;;  %v251_v9 = vrot.slane %v250_v7, 4  ;;  %v289_v23 = vsub.s32 0, %v286_v21  ;;  %v293_v25 = vsub.s32 1, %v286_v21  ;;  %p667_p8 = scmp.ne.s32.totalorder %s407_s26, %s666_s8  ;;  %s757_s30 = smov [#allocation8]  }
  0x40   : > { %v334_v58 = vunpack.c.0.s8 %v333_v55  ;;  %s670_s4 = sshll.u32 %s757_s30, 4  ;;  %s671_s4 = int_to_ptr.vmem [resolvable:$false] %s670_s4 }
  0x41   : > { %v246_v10 = vrot.slane %v245_v8, 2  ;;  %v252_v11 = vmax.f32 %v250_v7, %v251_v9  ;;  %v290_v26 = vrot.slane %v238_v24, %v289_v23  ;;  %v294_v27 = vrot.slane %v238_v24, %v293_v25  ;;  %p668_p0 = pnand %p667_p8, %p824_p9  ;;  %s672_s6 = scalar_lea.vmem %s671_s4, 32 }
  0x42   : > { %v337_v63 = vsub.s32 %v334_v58, %v286_v21  ;;  %p673_p13 = scmp.lt.s32.totalorder %s407_s26, %s671_s4  ;;  %p674_p5 = scmp.lt.s32.totalorder %s672_s6, %s666_s8 }
  0x43   : > { %v247_v12 = vmax.f32 %v245_v8, %v246_v10  ;;  %v253_v13 = vrot.slane %v252_v11, 2  ;;  %vm295_vm2 = vcmp.eq.s32.totalorder %v286_v21, %v290_v26  ;;  %vm296_vm3 = vcmp.eq.s32.totalorder %v286_v21, %v294_v27  ;;  %p669_p3 = pneg %p668_p0 }
  0x44   : > { %p675_p12 = por %p674_p5, %p673_p13 }
  0x45   : > { %v248_v14 = vrot.slane %v247_v12, 1  ;;  %v254_v15 = vmax.f32 %v252_v11, %v253_v13 }
  0x46   : > { %p676_p6 = pnand %p675_p12, %p669_p3 }
  0x47   : > { %v249_v16 = vmax.f32 %v247_v12, %v248_v14  ;;  %v255_v17 = vrot.slane %v254_v15, 1 }
  0x49   : > { %v256_v18 = vmax.f32 %v254_v15, %v255_v17  ;;  %v376_v15 = vld [vmem:[#allocation2] sm:$0x3] }
  0x4b   : > { %v259_v19 = vcombine.low %v249_v16, %v256_v18 }
  0x4d   : > { %v261_v20 = vsub.f32 %v237_v3, %v259_v19  ;;  %v338_v3 = vrot.slane %v331_v62, %v337_v63 }
  0x4f   : > { %v262_v22 = vmul.f32 1.442695, %v261_v20  ;;  %v298_v28 = vcombine.high %v261_v20, %v261_v20  ;;  %v300_v30 = vsel %vm295_vm2, %v261_v20, 0.0  ;;  %v345_v10 = vrot.slane %v338_v3, %v337_v63 }
  0x50   : > { %v302_v36 = vsel %vm242_vm1, %v300_v30, 0.0 }
  0x51   : > { %604 = vpow2.f32 %v262_v22  ;;  %v301_v34 = vsel %vm296_vm3, %v298_v28, 0.0  ;;  %v303_v42 = vrot.slane %v302_v36, 4  ;;  %vm346_vm5 = vcmp.ne.s32.totalorder %v345_v10, 0 }
  0x52   : > { %v309_v39 = vsel %vm242_vm1, %v301_v34, 0.0  ;;  %vm347_vm6 = vmand %vm326_vm4, %vm346_vm5 }
  0x53   : > { %v310_v45 = vrot.slane %v309_v39, 4  ;;  %v304_v48 = vadd.f32 %v303_v42, %v302_v36 }
  0x55   : > { %v311_v51 = vadd.f32 %v310_v45, %v309_v39  ;;  %v305_v53 = vrot.slane %v304_v48, 2 }
  0x57   : > { %v312_v56 = vrot.slane %v311_v51, 2  ;;  %v306_v57 = vadd.f32 %v305_v53, %v304_v48 }
  0x59   : > { %v313_v59 = vadd.f32 %v312_v56, %v311_v51  ;;  %v307_v60 = vrot.slane %v306_v57, 1 }
  0x5b   : > { %v314_v0 = vrot.slane %v313_v59, 1  ;;  %v308_v2 = vadd.f32 %v307_v60, %v306_v57 }
  0x5d   : > { %v315_v6 = vadd.f32 %v314_v0, %v313_v59 }
  0x5e   : > { %v605_v29 = vpop.eup %604 }
  0x5f   : > { %v265_v31 = vcombine.high %v605_v29, %v605_v29  ;;  %v267_v32 = vsel %vm242_vm1, %v605_v29, 0.0 }
  0x60   : > { %v268_v33 = vrot.slane %v267_v32, 4 }
  0x61   : > { %v274_v35 = vsel %vm242_vm1, %v265_v31, 0.0 }
  0x62   : > { %v269_v37 = vadd.f32 %v268_v33, %v267_v32  ;;  %v275_v38 = vrot.slane %v274_v35, 4 }
  0x64   : > { %v270_v40 = vrot.slane %v269_v37, 2  ;;  %v276_v41 = vadd.f32 %v275_v38, %v274_v35 }
  0x66   : > { %v271_v43 = vadd.f32 %v270_v40, %v269_v37  ;;  %v277_v44 = vrot.slane %v276_v41, 2 }
  0x68   : > { %v272_v46 = vrot.slane %v271_v43, 1  ;;  %v278_v47 = vadd.f32 %v277_v44, %v276_v41 }
  0x6a   : > { %v273_v49 = vadd.f32 %v272_v46, %v271_v43  ;;  %v279_v50 = vrot.slane %v278_v47, 1 }
  0x6c   : > { %v280_v52 = vadd.f32 %v279_v50, %v278_v47  ;;  %606 = vlog2.f32 %v273_v49 }
  0x6e   : > { %608 = vlog2.f32 %v280_v52 }
  0x79   : > { %v607_v4 = vpop.eup %606 }
  0x7a   : > { %v282_v5 = vmul.f32 0.6931472, %v607_v4 }
  0x7b   : > { %v609_v7 = vpop.eup %608 }
  0x7c   : > { %v284_v8 = vmul.f32 0.6931472, %v609_v7  ;;  %v316_v9 = vsub.f32 %v282_v5, %v308_v2 }
  0x7e   : > { %v317_v11 = vsub.f32 %v284_v8, %v315_v6 }
  0x80   : > { %v350_v12 = vcombine.low %v316_v9, %v317_v11 }
  0x82   : > { %v357_v13 = vrot.slane %v350_v12, %v337_v63 }
  0x84   : > { %v364_v14 = vrot.slane %v357_v13, %v337_v63 }
  0x86   : > { %v366_v16 = vsel %vm347_vm6, %v364_v14, 0.0 }
  0x87   : > { %v377_v17 = vadd.f32 %v376_v15, %v366_v16 }
  0x89   : > { %382 = vst.msk [vmem:[#allocation2] sm:$0x3] %vm897_vm0, %v377_v17 }
  0x90   : > { %v386_v18 = vld [vmem:[#allocation2] sm:$0x3] }
  0x91   : > { %v388_v19 = vrot.slane %v386_v18, 1 }
  0x93   : > { %v390_v20 = vadd.f32 %v388_v19, %v386_v18 }
  0x95   : > { %391 = vst [vmem:[%s231_s21] sm:$0x1] %v390_v20 }
  0x96   : > { %679 = shalt.err (!%p676_p6)
}
  0x97   : > { %s680_s12 = scalar_lea.hbm %s404_s3, 16  ;;  %s684_s16 = scalar_lea.hbm %s954_s2, 32 }
  0x98   : > { %p681_p7 = scmp.ne.s32.totalorder %s404_s3, %s680_s12  ;;  %p685_p4 = scmp.lt.s32.totalorder %s404_s3, %s954_s2 }
  0x99   : > { %p686_p10 = scmp.lt.s32.totalorder %s684_s16, %s680_s12 }
  0x9a   : > { %p682_p1 = pnand %p681_p7, %p824_p9 }
  0x9b   : > { %p687_p8 = por %p686_p10, %p685_p4 }
  0x9c   : > { %p683_p2 = pneg %p682_p1 }
  0x9e   : > { %p688_p0 = pnand %p687_p8, %p683_p2 }
  0xa0   : > { %691 = shalt.err (!%p688_p0)
}
  0xa1   : > { %537 = dma.vmem_to_hbm [thread:$0]  (%p824_p9), %s407_s26, 16, %s404_s3, %s393_s7  }
  0xa2 PF: > { %s418_s18 = sand.u32 1, %s730_s9   ;;  %p963_p3 = scmp.ge.s32.totalorder %s750_s14, 2 }
  0xa3   : > { %s419_s20 = scalar_lea.sflag [#allocation5], %s418_s18 }
  0xa4   : > { %p547_p13 = pnand %p963_p3, %p831_p11 }
  0xa6   : > { %p548_p5 = pneg %p547_p13 }
  0xa8   : > { %725 = dma.done.wait (%p548_p5), %s419_s20, 16  }
  0xa9   : > { %727 = vsyncadd (%p548_p5), %s419_s20, 4294967280  ;;  %s21_s14 = sadd.s32 1, %s750_s14   ;;  %s964_s9 = smov %s734_s10 }
  0xaa   : > { %p18_p12 = scmp.ge.s32.totalorder %s21_s14, 4   ;;  %s965_s10 = smov %s738_s11 }
  0xab   : > { %s966_s11 = smov %s829_s23  ;;  %s967_s12 = smov %s746_s13 }
  0xac   : > { %s968_s13 = smov %s970_s17  ;;  %20 = sbr.rel (!%p18_p12) target bundleno = 8 (0x8), region = 94 }
  0xb1   :  { %423 = vsyncpa [#allocation4], 1 }
  0xb2   :  { %425 = vsyncpa [#allocation4 + $0x1], 1 }
  0xb3   :  { %426 = vsyncpa [#allocation7], 1 }
  0xb4   :  { %428 = vsyncpa [#allocation7 + $0x1], 1 }
  0xb5   :  { %429 = vsyncpa [#allocation5], 1 }
  0xb6   :  { %431 = vsyncpa [#allocation5 + $0x1], 1 }

</bundles_post_ra>
